<compile_context>
chip_gen: v6e
topology: v6e:2x2x1
jax: 0.10.0
libtpu: 0.0.40
codegen_flags: <defaults>
</compile_context>

<pallas_src>
import math
import functools

import jax
import jax.numpy as jnp
from jax.experimental import pallas as pl
from jax.experimental.pallas import tpu as pltpu


TWO_PI = 2.0 * math.pi


def _round_up(x, m):
    return ((x + m - 1) // m) * m


# ----------------------------------------------------------------------------
# Prompt-path kernel: (tm, 2) normalized coords -> (tm, F) encodings [sin|cos]
# ----------------------------------------------------------------------------
def _prompt_enc_kernel(xy_ref, gauss_ref, out_ref, *, f_half):
    xy = xy_ref[...].astype(jnp.float32)                 # (tm, 2)
    xn = 2.0 * xy[:, 0:1] - 1.0                          # (tm, 1)  x in [-1,1]
    yn = 2.0 * xy[:, 1:2] - 1.0                          # (tm, 1)  y in [-1,1]
    g = gauss_ref[...].astype(jnp.float32)               # (2, f_half)
    gx = g[0:1, :]                                       # (1, f_half)
    gy = g[1:2, :]                                       # (1, f_half)
    # K=2 contraction as VPU outer product (MXU would run at <2% utilization).
    enc = (xn * gx + yn * gy) * TWO_PI                   # (tm, f_half)
    # Direct lane-dense slice stores (no concatenate temporary).
    out_ref[:, :f_half] = jnp.sin(enc)
    out_ref[:, f_half:] = jnp.cos(enc)


@functools.partial(jax.jit, static_argnames=("tm",))
def _encode_rows(flat_xy, gaussian_matrix, *, tm):
    """flat_xy: (M_pad, 2) with M_pad a multiple of tm. Returns (M_pad, F) f32."""
    m_pad = flat_xy.shape[0]
    f_half = gaussian_matrix.shape[1]
    f = 2 * f_half
    kernel = functools.partial(_prompt_enc_kernel, f_half=f_half)
    return pl.pallas_call(
        kernel,
        out_shape=jax.ShapeDtypeStruct((m_pad, f), jnp.float32),
        grid_spec=pltpu.PrefetchScalarGridSpec(
            num_scalar_prefetch=0,
            grid=(m_pad // tm,),
            in_specs=[
                pl.BlockSpec((tm, 2), lambda i: (i, 0)),       # coord rows tile
                pl.BlockSpec((2, f_half), lambda i: (0, 0)),   # full gaussian mat
            ],
            out_specs=pl.BlockSpec((tm, f), lambda i: (i, 0)),
        ),
        compiler_params=pltpu.CompilerParams(
            dimension_semantics=("parallel",),
        ),
        cost_estimate=pl.CostEstimate(
            flops=6 * m_pad * f_half,
            transcendentals=m_pad * f,
            bytes_accessed=m_pad * (f + 2) * 4,
        ),
    )(flat_xy, gaussian_matrix)


# ----------------------------------------------------------------------------
# Full-grid kernel: output block is (F, tm) with flattened pixel index on the
# lane axis; coordinates are generated from program_id + iota (no input DMA
# for coordinates, no wrapper-side transpose afterwards).
# ----------------------------------------------------------------------------
def _grid_enc_kernel(gt_ref, out_ref, *, h, w, f_half, tm):
    i = pl.program_id(0)
    lin = i * tm + jax.lax.broadcasted_iota(jnp.int32, (1, tm), 1)   # (1, tm)
    row = lin // w
    col = lin - row * w
    # normalized coords mapped straight to [-1, 1]
    xn = (2.0 / w) * (col.astype(jnp.float32) + 0.5) - 1.0           # (1, tm)
    yn = (2.0 / h) * (row.astype(jnp.float32) + 0.5) - 1.0           # (1, tm)
    gt = gt_ref[...].astype(jnp.float32)                             # (f_half, 2)
    gx = gt[:, 0:1]                                                  # (f_half, 1)
    gy = gt[:, 1:2]                                                  # (f_half, 1)
    enc_t = (gx * xn + gy * yn) * TWO_PI                             # (f_half, tm)
    out_ref[:f_half, :] = jnp.sin(enc_t)
    out_ref[f_half:, :] = jnp.cos(enc_t)


@functools.partial(jax.jit, static_argnames=("h", "w", "tm"))
def _encode_grid_transposed(gaussian_matrix_t, *, h, w, tm):
    """Returns (F, HW_pad) with HW_pad = round_up(h*w, tm); column = pixel."""
    f_half = gaussian_matrix_t.shape[0]
    f = 2 * f_half
    hw_pad = _round_up(h * w, tm)
    kernel = functools.partial(_grid_enc_kernel, h=h, w=w, f_half=f_half, tm=tm)
    return pl.pallas_call(
        kernel,
        out_shape=jax.ShapeDtypeStruct((f, hw_pad), jnp.float32),
        grid_spec=pltpu.PrefetchScalarGridSpec(
            num_scalar_prefetch=0,
            grid=(hw_pad // tm,),
            in_specs=[pl.BlockSpec((f_half, 2), lambda i: (0, 0))],
            out_specs=pl.BlockSpec((f, tm), lambda i: (0, i)),
        ),
        compiler_params=pltpu.CompilerParams(
            dimension_semantics=("parallel",),
        ),
        cost_estimate=pl.CostEstimate(
            flops=6 * hw_pad * f_half,
            transcendentals=hw_pad * f,
            bytes_accessed=hw_pad * f * 4,
        ),
    )(gaussian_matrix_t)


# ----------------------------------------------------------------------------
# Module-equivalent wrapper (parameter setup + reshape glue in plain JAX)
# ----------------------------------------------------------------------------
class SAMV2CoordinateEncoder:
    def __init__(self, output_channels, key):
        num_coords = 2
        num_positional_features = output_channels // num_coords
        # TODO(synk): PyTorch allocates torch.empty for gaussian_matrix (filled by
        # loaded weights / SAM's scaled randn); deterministic randn used here.
        self.gaussian_matrix = jax.random.normal(
            key, (num_coords, num_positional_features), dtype=jnp.float32
        )
        # Precompute the transposed projection once for the full-grid kernel.
        self.gaussian_matrix_t = jnp.transpose(self.gaussian_matrix)  # (F/2, 2)
        self.output_channels = 2 * num_positional_features

    # ---- prompt encodings --------------------------------------------------
    def _encode(self, xy_norm_tensor):
        orig_shape = xy_norm_tensor.shape
        flat = jnp.asarray(xy_norm_tensor, jnp.float32).reshape(-1, 2)
        m = flat.shape[0]
        # Adaptive row tile: multiple of 8, large enough to amortize per-step
        # overhead without padding tiny prompt batches up to huge blocks.
        tm = min(512, _round_up(max(m, 1), 8))
        m_pad = _round_up(max(m, 1), tm)
        if m_pad != m:
            flat = jnp.pad(flat, ((0, m_pad - m), (0, 0)))
        out = _encode_rows(flat, self.gaussian_matrix, tm=tm)
        if m_pad != m:
            out = out[:m]
        return out.reshape(*orig_shape[:-1], self.output_channels)

    def forward(self, *xy_norm_coords_tensors):
        results = []
        for xy_norm_tensor in xy_norm_coords_tensors:
            if xy_norm_tensor is None:
                results.append(None)
                continue
            results.append(self._encode(xy_norm_tensor))
        return results if len(results) > 1 else results[0]

    # ---- full grid encoding (NCHW) -----------------------------------------
    def get_full_grid_encoding(self, patch_grid_hw):
        h, w = patch_grid_hw
        hw = h * w
        # Lane-dense column tile (multiple of 128), capped at 1024 columns
        # (256x1024 f32 block = 1 MiB, double-buffered 2 MiB -> fits every
        # generation's scoped VMEM default). Prefer >=2 grid steps so
        # dimension_semantics=('parallel',) can shard across v7x's 2 TCs.
        tm = min(1024, _round_up(hw, 128))
        hw_pad = _round_up(hw, tm)
        if hw_pad // tm < 2 and tm >= 256 and tm % 256 == 0:
            tm //= 2
            hw_pad = _round_up(hw, tm)
        enc_t = _encode_grid_transposed(self.gaussian_matrix_t, h=h, w=w, tm=tm)
        if hw_pad != hw:
            enc_t = enc_t[:, :hw]
        # Kernel already produced (F, pixel) layout -> NCHW is a free reshape.
        return enc_t.reshape(1, self.output_channels, h, w)


# ----------------------------------------------------------------------------
# Pure-JAX reference for correctness checking
# ----------------------------------------------------------------------------
def _reference_forward(xy, gaussian_matrix):
    xy = 2.0 * jnp.asarray(xy, jnp.float32) - 1.0
    enc = xy @ gaussian_matrix * (2.0 * jnp.pi)
    return jnp.concatenate([jnp.sin(enc), jnp.cos(enc)], axis=-1)


if __name__ == "__main__":
    key = jax.random.PRNGKey(0)
    k_gauss, k_pts, k_box = jax.random.split(key, 3)

    output_channels = 256  # F (default SAM width); gaussian matrix is (2, 128)
    encoder = SAMV2CoordinateEncoder(output_channels, k_gauss)

    # Point prompts: (B, N, 2) ; box prompts: (B, N, 2, 2) — normalized coords.
    points = jax.random.uniform(k_pts, (2, 8, 2), dtype=jnp.float32)
    boxes = jax.random.uniform(k_box, (2, 4, 2, 2), dtype=jnp.float32)

    pts_enc, box_enc = encoder.forward(points, boxes)
    grid_enc = encoder.get_full_grid_encoding((16, 16))

    pts_enc = jax.block_until_ready(pts_enc)
    box_enc = jax.block_until_ready(box_enc)
    grid_enc = jax.block_until_ready(grid_enc)

    assert pts_enc.shape == (2, 8, output_channels)
    assert box_enc.shape == (2, 4, 2, output_channels)
    assert grid_enc.shape == (1, output_channels, 16, 16)

    # Correctness vs pure-JAX reference
    ref_pts = _reference_forward(points, encoder.gaussian_matrix)
    ref_box = _reference_forward(boxes, encoder.gaussian_matrix)
    x_embed = (jnp.arange(16, dtype=jnp.float32) + 0.5) / 16
    y_embed = (jnp.arange(16, dtype=jnp.float32) + 0.5) / 16
    xy_grid = jnp.stack(
        [jnp.tile(x_embed[None, :], (16, 1)),
         jnp.tile(y_embed[None, :], (16, 1)).T], axis=-1)
    ref_grid = jnp.transpose(
        _reference_forward(xy_grid, encoder.gaussian_matrix), (2, 0, 1))[None]

    assert jnp.allclose(pts_enc, ref_pts, atol=1e-4, rtol=1e-4)
    assert jnp.allclose(box_enc, ref_box, atol=1e-4, rtol=1e-4)
    assert jnp.allclose(grid_enc, ref_grid, atol=1e-4, rtol=1e-4)

    print("KERNEL_OK")
</pallas_src>

<mosaic_0001>
module attributes {stable_mosaic.version = 11 : i64} {
  func.func @_prompt_enc_kernel(%arg0: i32, %arg1: memref<16x2xf32, #tpu.memory_space<vmem>>, %arg2: memref<2x128xf32, #tpu.memory_space<vmem>>, %arg3: memref<16x256xf32, #tpu.memory_space<vmem>>) attributes {dimension_semantics = [#tpu.dimension_semantics<parallel>], iteration_bounds = array<i64: 1>, scalar_prefetch = 0 : i64, scratch_operands = 0 : i64, tpu.core_type = #tpu.core_type<tc>, window_params = [{transform_indices = @transform_0, window_bounds = array<i64: 16, 2>}, {pipeline_mode = #tpu.pipeline_mode<synchronous>, transform_indices = @transform_1, window_bounds = array<i64: 2, 128>}, {transform_indices = @transform_2, window_bounds = array<i64: 16, 256>}]} {
    %c0 = arith.constant 0 : index
    %c0_0 = arith.constant 0 : index
    %0 = vector.load %arg1[%c0, %c0_0] : memref<16x2xf32, #tpu.memory_space<vmem>>, vector<16x2xf32>
    %1 = vector.extract_strided_slice %0 {offsets = [0, 0], sizes = [16, 1], strides = [1, 1]} : vector<16x2xf32> to vector<16x1xf32>
    %cst = arith.constant 2.000000e+00 : f32
    %2 = vector.broadcast %cst : f32 to vector<16x1xf32>
    %3 = arith.mulf %2, %1 : vector<16x1xf32>
    %cst_1 = arith.constant 1.000000e+00 : f32
    %4 = vector.broadcast %cst_1 : f32 to vector<16x1xf32>
    %5 = arith.subf %3, %4 : vector<16x1xf32>
    %6 = vector.extract_strided_slice %0 {offsets = [0, 1], sizes = [16, 1], strides = [1, 1]} : vector<16x2xf32> to vector<16x1xf32>
    %cst_2 = arith.constant 2.000000e+00 : f32
    %7 = vector.broadcast %cst_2 : f32 to vector<16x1xf32>
    %8 = arith.mulf %7, %6 : vector<16x1xf32>
    %cst_3 = arith.constant 1.000000e+00 : f32
    %9 = vector.broadcast %cst_3 : f32 to vector<16x1xf32>
    %10 = arith.subf %8, %9 : vector<16x1xf32>
    %c0_4 = arith.constant 0 : index
    %c0_5 = arith.constant 0 : index
    %11 = vector.load %arg2[%c0_4, %c0_5] : memref<2x128xf32, #tpu.memory_space<vmem>>, vector<2x128xf32>
    %12 = vector.extract_strided_slice %11 {offsets = [0, 0], sizes = [1, 128], strides = [1, 1]} : vector<2x128xf32> to vector<1x128xf32>
    %13 = vector.extract_strided_slice %11 {offsets = [1, 0], sizes = [1, 128], strides = [1, 1]} : vector<2x128xf32> to vector<1x128xf32>
    %14 = vector.broadcast %5 : vector<16x1xf32> to vector<16x128xf32>
    %15 = vector.broadcast %12 : vector<1x128xf32> to vector<16x128xf32>
    %16 = arith.mulf %14, %15 : vector<16x128xf32>
    %17 = vector.broadcast %10 : vector<16x1xf32> to vector<16x128xf32>
    %18 = vector.broadcast %13 : vector<1x128xf32> to vector<16x128xf32>
    %19 = arith.mulf %17, %18 : vector<16x128xf32>
    %20 = arith.addf %16, %19 : vector<16x128xf32>
    %cst_6 = arith.constant 6.28318548 : f32
    %21 = vector.broadcast %cst_6 : f32 to vector<16x128xf32>
    %22 = arith.mulf %20, %21 : vector<16x128xf32>
    %23 = math.sin %22 : vector<16x128xf32>
    %c0_7 = arith.constant 0 : index
    %c0_8 = arith.constant 0 : index
    %24 = vector.load %arg3[%c0_7, %c0_8] : memref<16x256xf32, #tpu.memory_space<vmem>>, vector<16x128xf32>
    tpu.vector_store %arg3[%c0_7, %c0_8], %23 {strides = array<i32>} : memref<16x256xf32, #tpu.memory_space<vmem>>, vector<16x128xf32>,
    %25 = math.cos %22 : vector<16x128xf32>
    %c0_9 = arith.constant 0 : index
    %c128 = arith.constant 128 : index
    %26 = vector.load %arg3[%c0_9, %c128] : memref<16x256xf32, #tpu.memory_space<vmem>>, vector<16x128xf32>
    tpu.vector_store %arg3[%c0_9, %c128], %25 {strides = array<i32>} : memref<16x256xf32, #tpu.memory_space<vmem>>, vector<16x128xf32>,
    return
  }
  func.func @transform_0(%arg0: i32) -> (i32, i32) {
    %c0_i32 = arith.constant 0 : i32
    %c0_i32_0 = arith.constant 0 : i32
    return %arg0, %c0_i32 : i32, i32
  }
  func.func @transform_1(%arg0: i32) -> (i32, i32) {
    %c0_i32 = arith.constant 0 : i32
    %c0_i32_0 = arith.constant 0 : i32
    %c0_i32_1 = arith.constant 0 : i32
    return %c0_i32, %c0_i32_0 : i32, i32
  }
  func.func @transform_2(%arg0: i32) -> (i32, i32) {
    %c0_i32 = arith.constant 0 : i32
    %c0_i32_0 = arith.constant 0 : i32
    return %arg0, %c0_i32 : i32, i32
  }
}

</mosaic_0001>

<bundles_post_ra>
// kernel: _encode_rows.1
= control target key start
LH: loop header
LB: loop body
LE: loop exit
PB: predicated region body
PF: predicated region fallthrough
CT: control target
= control target key end

     0   :  { %v557_v2 = vmov 1   ;;  %v558_v3 = vmov 0   ;;  %s655_s0 = inlined_call_operand.vmem [shape: f32[16,2], index: 0, kind: input, shape index: {}]   ;;  %s656_s1 = inlined_call_operand.vmem [shape: f32[2,128], index: 1, kind: input, shape index: {}]   ;;  %s657_s2 = inlined_call_operand.hbm [shape: f32[16,256], index: 2, kind: output, shape index: {}]  }
   0x1   :  { %v12_v0 = vld [vmem:[%s655_s0] sm:$0xff]  ;;  %v13_v1 = vld [vmem:[%s655_s0 + $0x8] sm:$0xff]  ;;  %525 = vset.pattern.permute.xlu1 %v557_v2  ;;  %524 = vset.pattern.permute.xlu0 %v558_v3 }
   0x2   :  { %v14_v4 = vmul.f32 2.0, %v12_v0  ;;  %v15_v5 = vmul.f32 2.0, %v13_v1 }
   0x4   :  { %v487_v6 = vadd.f32 -1.0, %v14_v4 }
   0x5   :  { %7 = vsyncpa [#allocation3], 0  ;;  %v488_v7 = vadd.f32 -1.0, %v15_v5  ;;  %v29_v8 = vlaneseq  ;;  %v18_v12 = vld [vmem:[%s656_s1] sm:$0x3]  ;;  %s565_s1 = smov [#allocation2]  }
   0x6   :  { %36 = vperm.xlu1 %525, %v487_v6   ;;  %21 = vperm.xlu0 %524, %v487_v6   ;;  %v559_v43 = vmov 683565275   ;;  %v560_v47 = vmov 2475754826   ;;  %v561_v49 = vmov 2131351028  }
   0x7   :  { %v30_v9 = vshrl.u32 %v29_v8, 7  ;;  %v562_v51 = vmov 2102212464   ;;  %v563_v53 = vmov 920167782   ;;  %s476_s14 = sshll.u32 %s565_s1, 4  ;;  %s477_s14 = int_to_ptr.vmem [resolvable:$true] %s476_s14 }
   0x8   :  { %v564_v60 = vmov 1326507024   ;;  %s535_s15 = scalar_lea.vmem %s477_s14, 512  ;;  %p540_p1 = scmp.lt.s32.totalorder %s477_s14, %s477_s14 }
   0x9   :  { %v45_v10 = vsub.s32 1, %v30_v9  ;;  %v31_v11 = vsub.s32 0, %v30_v9  ;;  %p536_p0 = scmp.ne.s32.totalorder %s477_s14, %s535_s15  ;;  %p541_p2 = scmp.lt.s32.totalorder %s535_s15, %s535_s15 }
   0xa   :  { %40 = vperm.xlu1 %525, %v488_v7   ;;  %26 = vperm.xlu0 %524, %v488_v7  }
   0xb   :  { %v46_v13 = vrot.slane %v18_v12, %v45_v10  ;;  %v32_v14 = vrot.slane %v18_v12, %v31_v11  ;;  %p542_p3 = por %p541_p2, %p540_p1 }
   0xd   :  { %p543_p4 = pnand %p542_p3, %p536_p0 }
   0xe   :  { %526 = vset.pattern.permute.xlu0 %v557_v2 }
  0x81   :  { %v37_v15 = vpop.permute.xlu1 %36  ;;  %v22_v16 = vpop.permute.xlu0 %21 }
  0x82   :  { %v47_v17 = vmul.f32 %v46_v13, %v37_v15  ;;  %v33_v18 = vmul.f32 %v32_v14, %v22_v16 }
  0x84   :  { %v49_v19 = vadd.f32 %v47_v17, %v33_v18 }
  0x85   :  { %v41_v20 = vpop.permute.xlu1 %40  ;;  %v27_v21 = vpop.permute.xlu0 %26 }
  0x86   :  { %v592_v22 = vmul.f32 6.2831855, %v49_v19  ;;  %v48_v23 = vmul.f32 %v46_v13, %v41_v20  ;;  %v34_v24 = vmul.f32 %v32_v14, %v27_v21 }
  0x88   :  { %v53_v25 = vand.u32 2147483647, %v592_v22  ;;  %v56_v26 = vand.u32 2139095040, %v592_v22  ;;  %v50_v27 = vadd.f32 %v48_v23, %v34_v24  ;;  %vm55_vm14 = vcmp.lt.s32.totalorder %v592_v22, 0 }
  0x8a   :  { %v57_v28 = vshrl.u32 %v56_v26, 23  ;;  %v60_v29 = vand.u32 8388607, %v53_v25  ;;  %v598_v30 = vmul.f32 6.2831855, %v50_v27 }
  0x8b   :  { %vm54_vm15 = vcmp.le.f32.partialorder %v53_v25, 0.7853982 }
  0x8c   :  { %v489_v31 = vadd.s32 4294967169, %v57_v28  ;;  %v160_v32 = vand.u32 2139095040, %v598_v30  ;;  %v61_v34 = vor.u32 8388608, %v60_v29  ;;  %v157_v36 = vand.u32 2147483647, %v598_v30 }
  0x8e   :  { %v63_v33 = vadd.s32 1, %v489_v31  ;;  %v161_v35 = vshrl.u32 %v160_v32, 23  ;;  %v602_v41 = vshll.u32 %v61_v34, 8  ;;  %v164_v45 = vand.u32 8388607, %v157_v36 }
  0x90   :  { %vm64_vm0 = vcmp.gt.s32.totalorder %v63_v33, 0  ;;  %v493_v38 = vadd.s32 4294967169, %v161_v35  ;;  %v165_v11 = vor.u32 8388608, %v164_v45 }
  0x91   :  { %v65_v37 = vsel %vm64_vm0, %v63_v33, 0  ;;  %vm159_vm0 = vcmp.lt.s32.totalorder %v598_v30, 0 }
  0x92   :  { %v66_v39 = vshrl.u32 %v65_v37, 5  ;;  %v67_v40 = vand.u32 31, %v65_v37  ;;  %v167_v46 = vadd.s32 1, %v493_v38  ;;  %v205_v26 = vshll.u32 %v165_v11, 8 }
  0x94   :  { %v68_v42 = vsub.s32 32, %v67_v40  ;;  %v70_v44 = vshll.u32 %v559_v43, %v67_v40  ;;  %v73_v48 = vshll.u32 %v560_v47, %v67_v40  ;;  %v76_v50 = vshll.u32 %v561_v49, %v67_v40 }
  0x95   :  { %v79_v52 = vshll.u32 %v562_v51, %v67_v40  ;;  %v82_v54 = vshll.u32 %v563_v53, %v67_v40  ;;  %vm85_vm1 = vcmp.lt.s32.totalorder %v66_v39, 1  ;;  %vm87_vm2 = vcmp.lt.s32.totalorder %v66_v39, 3 }
  0x96   :  { %v71_v55 = vshrl.u32 %v560_v47, %v68_v42  ;;  %v74_v56 = vshrl.u32 %v561_v49, %v68_v42  ;;  %v77_v57 = vshrl.u32 %v562_v51, %v68_v42  ;;  %v69_v58 = vshrl.u32 %v559_v43, %v68_v42 }
  0x97   :  { %v80_v59 = vshrl.u32 %v563_v53, %v68_v42  ;;  %v83_v61 = vshrl.u32 %v564_v60, %v68_v42  ;;  %vm168_vm3 = vcmp.gt.s32.totalorder %v167_v46, 0  ;;  %vm88_vm4 = vcmp.lt.s32.totalorder %v66_v39, 4 }
  0x98   :  { %v72_v62 = vor.u32 %v71_v55, %v70_v44  ;;  %v75_v63 = vor.u32 %v74_v56, %v73_v48  ;;  %v78_v0 = vor.u32 %v77_v57, %v76_v50  ;;  %v169_v3 = vsel %vm168_vm3, %v167_v46, 0 }
  0x99   :  { %v81_v1 = vor.u32 %v80_v59, %v79_v52  ;;  %v84_v2 = vor.u32 %v83_v61, %v82_v54  ;;  %vm86_vm5 = vcmp.lt.s32.totalorder %v66_v39, 2  ;;  %v171_v14 = vand.u32 31, %v169_v3 }
  0x9a   :  { %v89_v4 = vsel %vm85_vm1, %v69_v58, %v72_v62  ;;  %v90_v5 = vsel %vm88_vm4, %v78_v0, 2102212464  ;;  %v93_v6 = vsel %vm85_vm1, %v72_v62, %v75_v63  ;;  %v97_v7 = vsel %vm85_vm1, %v75_v63, %v78_v0 }
  0x9b   :  { %v91_v8 = vsel %vm87_vm2, %v75_v63, %v90_v5  ;;  %v94_v9 = vsel %vm88_vm4, %v81_v1, 920167782  ;;  %v98_v10 = vsel %vm88_vm4, %v84_v2, 1326507024  ;;  %v170_v23 = vshrl.u32 %v169_v3, 5 }
  0x9c   :  { %v95_v12 = vsel %vm87_vm2, %v78_v0, %v94_v9  ;;  %v99_v13 = vsel %vm87_vm2, %v81_v1, %v98_v10  ;;  %v92_v15 = vsel %vm86_vm5, %v89_v4, %v91_v8  ;;  %v172_v24 = vsub.s32 32, %v171_v14 }
  0x9d   :  { %v96_v16 = vsel %vm86_vm5, %v93_v6, %v95_v12  ;;  %v100_v17 = vsel %vm86_vm5, %v97_v7, %v99_v13  ;;  %v108_v27 = vmul.u32 %v602_v41, %v92_v15  ;;  %v174_v28 = vshll.u32 %v559_v43, %v171_v14 }
  0x9e   :  { %v615_v18 = vmul.u32.u64.low %v602_v41, %v100_v17  ;;  %v616_v19 = vmul.u32.u64.high %v602_v41, %v100_v17, %v615_v18  ;;  %v619_v20 = vmul.u32.u64.low %v602_v41, %v96_v16  ;;  %v620_v21 = vmul.u32.u64.high %v602_v41, %v96_v16, %v619_v20 }
  0x9f   :  { %v177_v29 = vshll.u32 %v560_v47, %v171_v14  ;;  %v180_v31 = vshll.u32 %v561_v49, %v171_v14  ;;  %v175_v32 = vshrl.u32 %v560_v47, %v172_v24  ;;  %v178_v33 = vshrl.u32 %v561_v49, %v172_v24 }
  0xa0   :  { %v181_v34 = vshrl.u32 %v562_v51, %v172_v24  ;;  %v183_v35 = vshll.u32 %v562_v51, %v171_v14  ;;  %vm110_vm6 = vc.u32 %v616_v19, %v619_v20  ;;  %v111_v37 = vadd.s32 1, %v620_v21 }
  0xa1   :  { %v184_v38 = vshrl.u32 %v563_v53, %v172_v24  ;;  %v186_v39 = vshll.u32 %v563_v53, %v171_v14  ;;  %v176_v40 = vor.u32 %v175_v32, %v174_v28  ;;  %v179_v42 = vor.u32 %v178_v33, %v177_v29 }
  0xa2   :  { %v182_v44 = vor.u32 %v181_v34, %v180_v31  ;;  %v187_v45 = vshrl.u32 %v564_v60, %v172_v24  ;;  %v112_v41 = vsel %vm110_vm6, %v111_v37, %v620_v21  ;;  %vm189_vm7 = vcmp.lt.s32.totalorder %v170_v23, 1 }
  0xa3   :  { %v185_v46 = vor.u32 %v184_v38, %v183_v35  ;;  %vm192_vm8 = vcmp.lt.s32.totalorder %v170_v23, 4  ;;  %v113_v47 = vadd.s32 %v112_v41, %v108_v27  ;;  %vm191_vm9 = vcmp.lt.s32.totalorder %v170_v23, 3 }
  0xa4   :  { %v188_v48 = vor.u32 %v187_v45, %v186_v39  ;;  %v194_v49 = vsel %vm192_vm8, %v182_v44, 2102212464  ;;  %v173_v50 = vshrl.u32 %v559_v43, %v172_v24  ;;  %v197_v51 = vsel %vm189_vm7, %v176_v40, %v179_v42 }
  0xa5   :  { %v198_v52 = vsel %vm192_vm8, %v185_v46, 920167782  ;;  %v201_v54 = vsel %vm189_vm7, %v179_v42, %v182_v44  ;;  %v114_v55 = vadd.s32 536870912, %v113_v47  ;;  %vm190_vm10 = vcmp.lt.s32.totalorder %v170_v23, 2 }
  0xa6   :  { %v199_v53 = vsel %vm191_vm9, %v182_v44, %v198_v52  ;;  %v202_v56 = vsel %vm192_vm8, %v188_v48, 1326507024  ;;  %v193_v57 = vsel %vm189_vm7, %v173_v50, %v176_v40  ;;  %v195_v58 = vsel %vm191_vm9, %v179_v42, %v194_v49 }
  0xa7   :  { %v200_v59 = vsel %vm190_vm10, %v197_v51, %v199_v53  ;;  %v203_v60 = vsel %vm191_vm9, %v185_v46, %v202_v56  ;;  %v115_v61 = vshrl.u32 %v114_v55, 30  ;;  %v196_v3 = vsel %vm190_vm10, %v193_v57, %v195_v58 }
  0xa8   :  { %v204_v62 = vsel %vm190_vm10, %v201_v54, %v203_v60  ;;  %v630_v63 = vmul.u32.u64.low %v205_v26, %v200_v59  ;;  %v631_v0 = vmul.u32.u64.high %v205_v26, %v200_v59, %v630_v63  ;;  %v212_v6 = vmul.u32 %v205_v26, %v196_v3 }
  0xa9   :  { %v633_v1 = vmul.u32.u64.low %v205_v26, %v204_v62  ;;  %v634_v2 = vmul.u32.u64.high %v205_v26, %v204_v62, %v633_v1  ;;  %v116_v43 = vshll.u32 %v115_v61, 30  ;;  %v109_v18 = vadd.s32 %v619_v20, %v616_v19 }
  0xaa   :  { %v215_v5 = vadd.s32 1, %v631_v0  ;;  %v139_v45 = vsub.s32 4, %v115_v61  ;;  %vm158_vm1 = vcmp.le.f32.partialorder %v157_v36, 0.7853982  ;;  %vm145_vm8 = vweird.f32 %v592_v22 }
  0xab   :  { %v117_v4 = vsub.s32 %v113_v47, %v116_v43  ;;  %vm214_vm11 = vc.u32 %v634_v2, %v630_v63  ;;  %v213_v42 = vadd.s32 %v630_v63, %v634_v2 }
  0xac   :  { %v216_v8 = vsel %vm214_vm11, %v215_v5, %v631_v0  ;;  %v140_v52 = vsel %vm55_vm14, %v139_v45, %v115_v61 }
  0xad   :  { %v119_v7 = vsub.s32 0, %v117_v4  ;;  %v217_v9 = vadd.s32 %v216_v8, %v212_v6  ;;  %v142_v56 = vsel %vm54_vm15, 0, %v140_v52 }
  0xae   :  { %v146_v58 = vadd.s32 3, %v142_v56  ;;  %v356_v0 = vand.u32 3, %v142_v56 }
  0xaf   :  { %v490_v10 = vmin.u32 %v119_v7, %v117_v4  ;;  %v218_v11 = vadd.s32 536870912, %v217_v9 }
  0xb0   :  { %v147_v63 = vand.u32 3, %v146_v58  ;;  %vm361_vm3 = vcmp.eq.s32.totalorder %v356_v0, 2  ;;  %vm358_vm5 = vcmp.eq.s32.totalorder %v356_v0, 0  ;;  %vm357_vm7 = vcmp.lt.s32.totalorder %v356_v0, 2 }
  0xb1   :  { %v121_v12 = vclz %v490_v10  ;;  %v219_v13 = vshrl.u32 %v218_v11, 30 }
  0xb2   :  { %vm152_vm2 = vcmp.eq.s32.totalorder %v147_v63, 2  ;;  %vm149_vm4 = vcmp.eq.s32.totalorder %v147_v63, 0  ;;  %vm148_vm6 = vcmp.lt.s32.totalorder %v147_v63, 2 }
  0xb3   :  { %v491_v14 = vadd.s32 4294967294, %v121_v12  ;;  %v220_v15 = vshll.u32 %v219_v13, 30  ;;  %v243_v60 = vsub.s32 4, %v219_v13 }
  0xb5   :  { %vm492_vm12 = vcmp.lt.s32.totalorder %v491_v14, 0  ;;  %v221_v17 = vsub.s32 %v217_v9, %v220_v15  ;;  %v244_v61 = vsel %vm159_vm0, %v243_v60, %v219_v13 }
  0xb6   :  { %v124_v16 = vsel %vm492_vm12, 0, %v491_v14  ;;  %v246_v3 = vsel %vm158_vm1, 0, %v244_v61 }
  0xb7   :  { %v125_v21 = vsub.s32 32, %v124_v16  ;;  %v129_v23 = vsub.s32 4294967266, %v124_v16  ;;  %v223_v24 = vsub.s32 0, %v221_v17  ;;  %v126_v26 = vshll.u32 %v117_v4, %v124_v16 }
  0xb8   :  { %v250_v8 = vadd.s32 3, %v246_v3  ;;  %v459_v14 = vand.u32 3, %v246_v3 }
  0xb9   :  { %v127_v27 = vshrl.u32 %v109_v18, %v125_v21  ;;  %v130_v28 = vadd.s32 127, %v129_v23  ;;  %v494_v29 = vmin.u32 %v223_v24, %v221_v17 }
  0xba   :  { %v251_v13 = vand.u32 3, %v250_v8  ;;  %vm464_vm10 = vcmp.eq.s32.totalorder %v459_v14, 2  ;;  %vm461_vm12 = vcmp.eq.s32.totalorder %v459_v14, 0 }
  0xbb   :  { %v128_v31 = vor.u32 %v127_v27, %v126_v26  ;;  %v131_v32 = vshll.u32 %v130_v28, 23  ;;  %v225_v33 = vclz %v494_v29 }
  0xbc   :  { %vm256_vm9 = vcmp.eq.s32.totalorder %v251_v13, 2  ;;  %vm253_vm11 = vcmp.eq.s32.totalorder %v251_v13, 0 }
  0xbd   :  { %v132_v34 = vor.u32 4788187, %v131_v32  ;;  %v495_v35 = vadd.s32 4294967294, %v225_v33  ;;  %v135_v38 = vcvt.s32.f32 %v128_v31 }
  0xbf   :  { %v133_v37 = vand.u32 2147483647, %v132_v34  ;;  %vm496_vm13 = vcmp.lt.s32.totalorder %v495_v35, 0 }
  0xc0   :  { %v228_v40 = vsel %vm496_vm13, 0, %v495_v35  ;;  %vm252_vm13 = vcmp.lt.s32.totalorder %v251_v13, 2 }
  0xc1   :  { %v136_v39 = vmul.f32 %v135_v38, %v133_v37  ;;  %v229_v19 = vsub.s32 32, %v228_v40  ;;  %v233_v20 = vsub.s32 4294967266, %v228_v40  ;;  %v230_v41 = vshll.u32 %v221_v17, %v228_v40 }
  0xc3   :  { %v137_v44 = vxor.u32 2147483648, %v136_v39  ;;  %v231_v46 = vshrl.u32 %v213_v42, %v229_v19  ;;  %v234_v47 = vadd.s32 127, %v233_v20 }
  0xc5   :  { %v138_v48 = vsel %vm55_vm14, %v137_v44, %v136_v39  ;;  %v232_v50 = vor.u32 %v231_v46, %v230_v41  ;;  %v235_v51 = vshll.u32 %v234_v47, 23  ;;  %vm460_vm14 = vcmp.lt.s32.totalorder %v459_v14, 2 }
  0xc6   :  { %v141_v49 = vsel %vm54_vm15, %v592_v22, %v138_v48  ;;  %vm249_vm15 = vweird.f32 %v598_v30 }
  0xc7   :  { %527 = vcosq.f32 %v141_v49  ;;  %v236_v54 = vor.u32 4788187, %v235_v51  ;;  %v239_v53 = vcvt.s32.f32 %v232_v50 }
  0xc8   :  { %529 = vsinq.f32 %v141_v49 }
  0xc9   :  { %v237_v55 = vand.u32 2147483647, %v236_v54 }
  0xcb   :  { %v240_v57 = vmul.f32 %v239_v53, %v237_v55 }
  0xcd   :  { %v241_v59 = vxor.u32 2147483648, %v240_v57 }
  0xcf   :  { %v242_v25 = vsel %vm159_vm0, %v241_v59, %v240_v57 }
  0xd0   :  { %v245_v62 = vsel %vm158_vm1, %v598_v30, %v242_v25 }
  0xd1   :  { %531 = vcosq.f32 %v245_v62 }
  0xd2   :  { %533 = vsinq.f32 %v245_v62 }
  0xd4   :  { %v528_v1 = vpop.eup %527 }
  0xd5   :  { %v530_v2 = vpop.eup %529  ;;  %v153_v43 = vxor.u32 2147483648, %v528_v1 }
  0xd6   :  { %v150_v4 = vxor.u32 2147483648, %v530_v2 }
  0xd7   :  { %v154_v5 = vsel %vm152_vm2, %v153_v43, %v530_v2  ;;  %v363_v6 = vsel %vm361_vm3, %v153_v43, %v530_v2 }
  0xd8   :  { %v151_v36 = vsel %vm149_vm4, %v528_v1, %v150_v4  ;;  %v360_v7 = vsel %vm358_vm5, %v528_v1, %v150_v4 }
  0xd9   :  { %v155_v9 = vsel %vm148_vm6, %v151_v36, %v154_v5  ;;  %v364_v10 = vsel %vm357_vm7, %v360_v7, %v363_v6 }
  0xda   :  { %v156_v11 = vsel %vm145_vm8, nan, %v155_v9  ;;  %v365_v12 = vsel %vm145_vm8, nan, %v364_v10 }
  0xdb   :  { %261 = vst [vmem:[#allocation2] sm:$0xff] %v156_v11  ;;  %469 = vst [vmem:[#allocation2 + $0x8] sm:$0xff] %v365_v12 }
  0xde   :  { %v532_v15 = vpop.eup %531 }
  0xdf   :  { %v534_v16 = vpop.eup %533  ;;  %v257_v17 = vxor.u32 2147483648, %v532_v15 }
  0xe0   :  { %v254_v18 = vxor.u32 2147483648, %v534_v16 }
  0xe1   :  { %v258_v21 = vsel %vm256_vm9, %v257_v17, %v534_v16  ;;  %v466_v22 = vsel %vm464_vm10, %v257_v17, %v534_v16 }
  0xe2   :  { %v255_v23 = vsel %vm253_vm11, %v532_v15, %v254_v18  ;;  %v463_v24 = vsel %vm461_vm12, %v532_v15, %v254_v18 }
  0xe3   :  { %v259_v26 = vsel %vm252_vm13, %v255_v23, %v258_v21  ;;  %v467_v27 = vsel %vm460_vm14, %v463_v24, %v466_v22 }
  0xe4   :  { %v260_v28 = vsel %vm249_vm15, nan, %v259_v26  ;;  %v468_v29 = vsel %vm249_vm15, nan, %v467_v27 }
  0xe5   :  { %262 = vst [vmem:[#allocation2 + $0x10] sm:$0xff] %v260_v28  ;;  %470 = vst [vmem:[#allocation2 + $0x18] sm:$0xff] %v468_v29 }
  0xe6   :  { %546 = shalt.err (!%p543_p4)
}
  0xe7   :  { %s566_s16 = smov 256   ;;  %s567_s17 = smov 16  }
  0xe8   :  { %482 = dma.vmem_to_hbm [thread:$0]  %s477_s14, 512, %s657_s2, [#allocation3], %s566_s16, %s566_s16, %s567_s17  }
  0xe9   :  { %555 = dma.done.wait [#allocation3], 512  }
  0xea   :  { %556 = vsyncadd [#allocation3], 4294966784 }
  0xeb   :  { %486 = vsyncpa [#allocation3], 1 }

</bundles_post_ra>
